<compile_context>
chip_gen: v6e
topology: v6e:2x2x1
jax: 0.10.0
libtpu: 0.0.40
codegen_flags: <defaults>
</compile_context>

<pallas_src>
import jax
import jax.numpy as jnp
from jax.experimental import pallas as pl
from jax.experimental.pallas import tpu as pltpu

LANE = 128     # vreg lane width: pad the VMEM-internal hidden dim to this
SUBLANE = 16   # batch-tile granularity (covers f32 (8,.) and bf16 packed (16,.) tiles)


def _round_up(v, m):
    return ((v + m - 1) // m) * m


def _vmem_capacity_bytes():
    """Generation-aware VMEM capacity (v5e/v6e: 128 MiB, v7x: 64 MiB per TC)."""
    try:
        return int(pltpu.get_tpu_info().vmem_capacity_bytes)
    except Exception:
        return 64 * 1024 * 1024  # conservative fallback


def mlp_kernel(x_ref, w1_ref, b1_ref, w2_ref, b2_ref, o_ref):
    """One (TB, .) batch tile of y = relu(relu(x @ W1 + b1) @ W2 + b2).

    x/W1/W2 may be bf16 (MXU inputs); accumulation, bias add and ReLU stay f32.
    """
    h = jnp.dot(x_ref[...], w1_ref[...], preferred_element_type=jnp.float32)
    h = jnp.maximum(h + b1_ref[...], 0.0)
    y = jnp.dot(h.astype(w2_ref.dtype), w2_ref[...],
                preferred_element_type=jnp.float32)
    y = jnp.maximum(y + b2_ref[...], 0.0)
    o_ref[...] = y.astype(o_ref.dtype)


def nonlinear_latent_classifier(x, w1, b1, w2, b2, *,
                                block_b=2048,
                                compute_dtype=jnp.float32,
                                out_dtype=None):
    """x: (B, in_n); w1: (in_n, 64); b1: (64,); w2: (64, out_n); b2: (out_n,).

    Weights are stored transposed relative to PyTorch so the kernel computes x @ W.
    compute_dtype controls the MXU input dtype; bfloat16 is recommended on all TPU
    generations (v5e/v6e/v7x) for ~2x less input HBM traffic on this mem-bound op.
    out_dtype defaults to x.dtype; pass bfloat16 to halve output writeback bytes.
    """
    B, in_n = x.shape
    hidden = w1.shape[1]
    out_n = w2.shape[1]
    out_dtype = x.dtype if out_dtype is None else out_dtype
    cd_bytes = jnp.dtype(compute_dtype).itemsize
    out_bytes = jnp.dtype(out_dtype).itemsize

    # Only the hidden (VMEM-internal) dim is lane-padded; x and the output keep
    # their true feature widths (full-dim last axis is legal for BlockSpec).
    hid_p = _round_up(hidden, LANE)

    # Batch tile: full batch when it fits in one tile, otherwise a SUBLANE-rounded
    # tile with grid = cdiv(B, TB); Pallas masks the ragged last tile's store.
    if B <= block_b:
        TB = B
    else:
        TB = max(SUBLANE, (block_b // SUBLANE) * SUBLANE)
    grid_b = pl.cdiv(B, TB)

    # Zero-padding of the hidden dim is exact: padded W1 cols + zero bias ->
    # relu(0)=0 -> multiply zero W2 rows -> contributes nothing.
    x_c = x.astype(compute_dtype)
    w1p = jnp.zeros((in_n, hid_p), compute_dtype).at[:, :hidden].set(
        w1.astype(compute_dtype))
    w2p = jnp.zeros((hid_p, out_n), compute_dtype).at[:hidden, :].set(
        w2.astype(compute_dtype))
    b1p = jnp.zeros((1, hid_p), jnp.float32).at[0, :hidden].set(
        b1.astype(jnp.float32))
    b2p = b2.astype(jnp.float32).reshape(1, out_n)

    # Advisory cost estimate for XLA's scheduler.
    flops = 2 * B * (in_n * hid_p + hid_p * out_n)
    bytes_accessed = (x_c.size * cd_bytes
                      + (w1p.size + w2p.size) * cd_bytes
                      + (b1p.size + b2p.size) * 4
                      + B * out_n * out_bytes)

    # VMEM budget: double-buffered x/out tiles + resident weights/biases + f32 temps,
    # capped at 75% of this generation's physical VMEM (headroom for compiler scratch).
    vmem_bytes = (2 * TB * in_n * cd_bytes
                  + 2 * TB * out_n * out_bytes
                  + 2 * (in_n * hid_p + hid_p * out_n) * cd_bytes
                  + 2 * (hid_p + out_n) * 4
                  + TB * hid_p * 4 + TB * out_n * 4)
    vmem_limit = min(int(0.75 * _vmem_capacity_bytes()),
                     max(2 * vmem_bytes, 16 * 1024 * 1024))

    out = pl.pallas_call(
        mlp_kernel,
        out_shape=jax.ShapeDtypeStruct((B, out_n), out_dtype),
        grid_spec=pltpu.PrefetchScalarGridSpec(
            num_scalar_prefetch=0,
            grid=(grid_b,),
            in_specs=[
                pl.BlockSpec((TB, in_n), lambda i: (i, 0)),      # x: tiled over batch
                pl.BlockSpec((in_n, hid_p), lambda i: (0, 0)),   # W1: resident
                pl.BlockSpec((1, hid_p), lambda i: (0, 0)),      # b1: resident
                pl.BlockSpec((hid_p, out_n), lambda i: (0, 0)),  # W2: resident
                pl.BlockSpec((1, out_n), lambda i: (0, 0)),      # b2: resident
            ],
            out_specs=pl.BlockSpec((TB, out_n), lambda i: (i, 0)),
        ),
        compiler_params=pltpu.CompilerParams(
            dimension_semantics=("parallel",),
            vmem_limit_bytes=int(vmem_limit),
        ),
        cost_estimate=pl.CostEstimate(
            flops=int(flops), transcendentals=0, bytes_accessed=int(bytes_accessed)),
    )(x_c, w1p, b1p, w2p, b2p)

    return out


def _init_linear(key, fan_in, fan_out):
    # Deterministic init mimicking PyTorch nn.Linear default (uniform +/- 1/sqrt(fan_in)).
    kw, kb = jax.random.split(key)
    bound = 1.0 / (fan_in ** 0.5)
    w = jax.random.uniform(kw, (fan_in, fan_out), jnp.float32, -bound, bound)
    b = jax.random.uniform(kb, (fan_out,), jnp.float32, -bound, bound)
    return w, b


def _ref_forward(x, w1, b1, w2, b2):
    return jnp.maximum(jnp.maximum(x @ w1 + b1, 0.0) @ w2 + b2, 0.0)


if __name__ == "__main__":
    key = jax.random.PRNGKey(0)
    k_x, k_l1, k_l2, k_x2 = jax.random.split(key, 4)

    B, in_n, hidden, out_n = 8, 32, 64, 16

    x = jax.random.normal(k_x, (B, in_n), jnp.float32)
    w1, b1 = _init_linear(k_l1, in_n, hidden)
    w2, b2 = _init_linear(k_l2, hidden, out_n)

    ref_f32 = _ref_forward(x, w1, b1, w2, b2)

    # f32 path: exact-semantics check.
    out_f32 = jax.block_until_ready(
        nonlinear_latent_classifier(x, w1, b1, w2, b2, compute_dtype=jnp.float32))
    assert out_f32.shape == (B, out_n)
    assert jnp.allclose(out_f32, ref_f32, atol=1e-5, rtol=1e-5)

    # bf16 MXU fast path (recommended on v5e/v6e/v7x): matched-cast reference.
    out_bf16 = jax.block_until_ready(
        nonlinear_latent_classifier(x, w1, b1, w2, b2, compute_dtype=jnp.bfloat16))
    h_ref = jnp.maximum(
        jnp.dot(x.astype(jnp.bfloat16), w1.astype(jnp.bfloat16),
                preferred_element_type=jnp.float32) + b1, 0.0)
    ref_bf16 = jnp.maximum(
        jnp.dot(h_ref.astype(jnp.bfloat16), w2.astype(jnp.bfloat16),
                preferred_element_type=jnp.float32) + b2, 0.0)
    assert out_bf16.shape == (B, out_n)
    assert jnp.allclose(out_bf16, ref_bf16, atol=2e-2, rtol=2e-2)

    # Ragged-batch path (B not a multiple of the batch tile): exercises the
    # cdiv grid + masked last-tile store instead of padding the batch in HBM.
    B2 = 50
    x2 = jax.random.normal(k_x2, (B2, in_n), jnp.float32)
    out_ragged = jax.block_until_ready(
        nonlinear_latent_classifier(x2, w1, b1, w2, b2,
                                    block_b=16, compute_dtype=jnp.float32))
    ref_ragged = _ref_forward(x2, w1, b1, w2, b2)
    assert out_ragged.shape == (B2, out_n)
    assert jnp.allclose(out_ragged, ref_ragged, atol=1e-5, rtol=1e-5)

    print("KERNEL_OK")
</pallas_src>

<mosaic_0001>
module attributes {stable_mosaic.version = 11 : i64} {
  func.func @mlp_kernel(%arg0: i32, %arg1: memref<8x32xf32, #tpu.memory_space<vmem>>, %arg2: memref<32x128xf32, #tpu.memory_space<vmem>>, %arg3: memref<1x128xf32, #tpu.memory_space<vmem>>, %arg4: memref<128x16xf32, #tpu.memory_space<vmem>>, %arg5: memref<1x16xf32, #tpu.memory_space<vmem>>, %arg6: memref<8x16xf32, #tpu.memory_space<vmem>>) attributes {dimension_semantics = [#tpu.dimension_semantics<parallel>], iteration_bounds = array<i64: 1>, scalar_prefetch = 0 : i64, scratch_operands = 0 : i64, tpu.core_type = #tpu.core_type<tc>, window_params = [{transform_indices = @transform_0, window_bounds = array<i64: 8, 32>}, {pipeline_mode = #tpu.pipeline_mode<synchronous>, transform_indices = @transform_1, window_bounds = array<i64: 32, 128>}, {pipeline_mode = #tpu.pipeline_mode<synchronous>, transform_indices = @transform_2, window_bounds = array<i64: 1, 128>}, {pipeline_mode = #tpu.pipeline_mode<synchronous>, transform_indices = @transform_3, window_bounds = array<i64: 128, 16>}, {pipeline_mode = #tpu.pipeline_mode<synchronous>, transform_indices = @transform_4, window_bounds = array<i64: 1, 16>}, {transform_indices = @transform_5, window_bounds = array<i64: 8, 16>}]} {
    %c0 = arith.constant 0 : index
    %c0_0 = arith.constant 0 : index
    %0 = vector.load %arg1[%c0, %c0_0] : memref<8x32xf32, #tpu.memory_space<vmem>>, vector<8x32xf32>
    %c0_1 = arith.constant 0 : index
    %c0_2 = arith.constant 0 : index
    %1 = vector.load %arg2[%c0_1, %c0_2] : memref<32x128xf32, #tpu.memory_space<vmem>>, vector<32x128xf32>
    %cst = arith.constant dense<0.000000e+00> : vector<8x128xf32>
    %2 = tpu.matmul %0, %1, %cst {dimension_numbers = #tpu.dot_dimension_numbers<[1], [0], [0], [1], [0, 0, 1, 1], [], []>} : vector<8x32xf32>, vector<32x128xf32>, vector<8x128xf32> -> vector<8x128xf32>
    %c0_3 = arith.constant 0 : index
    %c0_4 = arith.constant 0 : index
    %3 = vector.load %arg3[%c0_3, %c0_4] : memref<1x128xf32, #tpu.memory_space<vmem>>, vector<1x128xf32>
    %4 = vector.broadcast %3 : vector<1x128xf32> to vector<8x128xf32>
    %5 = arith.addf %2, %4 : vector<8x128xf32>
    %cst_5 = arith.constant 0.000000e+00 : f32
    %6 = vector.broadcast %cst_5 : f32 to vector<8x128xf32>
    %7 = arith.maximumf %5, %6 : vector<8x128xf32>
    %c0_6 = arith.constant 0 : index
    %c0_7 = arith.constant 0 : index
    %8 = vector.load %arg4[%c0_6, %c0_7] : memref<128x16xf32, #tpu.memory_space<vmem>>, vector<128x16xf32>
    %cst_8 = arith.constant dense<0.000000e+00> : vector<8x16xf32>
    %9 = tpu.matmul %7, %8, %cst_8 {dimension_numbers = #tpu.dot_dimension_numbers<[1], [0], [0], [1], [0, 0, 1, 1], [], []>} : vector<8x128xf32>, vector<128x16xf32>, vector<8x16xf32> -> vector<8x16xf32>
    %c0_9 = arith.constant 0 : index
    %c0_10 = arith.constant 0 : index
    %10 = vector.load %arg5[%c0_9, %c0_10] : memref<1x16xf32, #tpu.memory_space<vmem>>, vector<1x16xf32>
    %11 = vector.broadcast %10 : vector<1x16xf32> to vector<8x16xf32>
    %12 = arith.addf %9, %11 : vector<8x16xf32>
    %cst_11 = arith.constant 0.000000e+00 : f32
    %13 = vector.broadcast %cst_11 : f32 to vector<8x16xf32>
    %14 = arith.maximumf %12, %13 : vector<8x16xf32>
    %c0_12 = arith.constant 0 : index
    %c0_13 = arith.constant 0 : index
    %15 = vector.load %arg6[%c0_12, %c0_13] : memref<8x16xf32, #tpu.memory_space<vmem>>, vector<8x16xf32>
    tpu.vector_store %arg6[%c0_12, %c0_13], %14 {strides = array<i32>} : memref<8x16xf32, #tpu.memory_space<vmem>>, vector<8x16xf32>,
    return
  }
  func.func @transform_0(%arg0: i32) -> (i32, i32) {
    %c0_i32 = arith.constant 0 : i32
    %c0_i32_0 = arith.constant 0 : i32
    return %arg0, %c0_i32 : i32, i32
  }
  func.func @transform_1(%arg0: i32) -> (i32, i32) {
    %c0_i32 = arith.constant 0 : i32
    %c0_i32_0 = arith.constant 0 : i32
    %c0_i32_1 = arith.constant 0 : i32
    return %c0_i32, %c0_i32_0 : i32, i32
  }
  func.func @transform_2(%arg0: i32) -> (i32, i32) {
    %c0_i32 = arith.constant 0 : i32
    %c0_i32_0 = arith.constant 0 : i32
    %c0_i32_1 = arith.constant 0 : i32
    return %c0_i32, %c0_i32_0 : i32, i32
  }
  func.func @transform_3(%arg0: i32) -> (i32, i32) {
    %c0_i32 = arith.constant 0 : i32
    %c0_i32_0 = arith.constant 0 : i32
    %c0_i32_1 = arith.constant 0 : i32
    return %c0_i32, %c0_i32_0 : i32, i32
  }
  func.func @transform_4(%arg0: i32) -> (i32, i32) {
    %c0_i32 = arith.constant 0 : i32
    %c0_i32_0 = arith.constant 0 : i32
    %c0_i32_1 = arith.constant 0 : i32
    return %c0_i32, %c0_i32_0 : i32, i32
  }
  func.func @transform_5(%arg0: i32) -> (i32, i32) {
    %c0_i32 = arith.constant 0 : i32
    %c0_i32_0 = arith.constant 0 : i32
    return %arg0, %c0_i32 : i32, i32
  }
}

</mosaic_0001>

<bundles_post_ra>
// kernel: tpu_custom_call.1
= control target key start
LH: loop header
LB: loop body
LE: loop exit
PB: predicated region body
PF: predicated region fallthrough
CT: control target
= control target key end

     0   :  { %v314_v1 = vmov 0.0   ;;  %vm315_vm0 = vmmov 0   ;;  %vm33_vm1 = vcmask 261120   ;;  %s443_s0 = inlined_call_operand.vmem [shape: f32[8,32], index: 0, kind: input, shape index: {}]   ;;  %s444_s1 = inlined_call_operand.vmem [shape: f32[32,128], index: 1, kind: input, shape index: {}]   ;;  %s445_s2 = inlined_call_operand.vmem [shape: f32[1,128], index: 2, kind: input, shape index: {}]   ;;  %s446_s3 = inlined_call_operand.vmem [shape: f32[128,16], index: 3, kind: input, shape index: {}]   ;;  %s447_s4 = inlined_call_operand.vmem [shape: f32[1,16], index: 4, kind: input, shape index: {}]   ;;  %s448_s5 = inlined_call_operand.hbm [shape: f32[8,16], index: 5, kind: output, shape index: {}]  }
   0x1   :  { %v25_v0 = vld [vmem:[%s444_s1 + $0x18] sm:$0xff]  ;;  %243 = vmatprep.subr.mxu0 %v314_v1  ;;  %v24_v2 = vld [vmem:[%s444_s1 + $0x10] sm:$0xff]  ;;  %251 = vmatprep.mubr.msk.f32.mxu0 %vm315_vm0, %v314_v1  ;;  %v23_v5 = vld [vmem:[%s444_s1 + $0x8] sm:$0xff] }
   0x2   :  { %v123_v3 = vld [vmem:[%s446_s3 + $0x78] sm:$0xff]  ;;  %244 = vmatpush3.msra.mxu0 %v25_v0  ;;  %254 = vmatprep.subr.mxu1 %v314_v1  ;;  %v122_v4 = vld [vmem:[%s446_s3 + $0x70] sm:$0xff]  ;;  %v121_v6 = vld [vmem:[%s446_s3 + $0x68] sm:$0xff] }
   0x3   :  { %245 = vmatprep.subr.mxu0 %v314_v1  ;;  %255 = vmatpush3.msra.mxu1 %v123_v3  ;;  %v22_v7 = vld [vmem:[%s444_s1] sm:$0xff] }
   0x4   :  { %246 = vmatpush3.msra.mxu0 %v24_v2  ;;  %256 = vmatprep.subr.mxu1 %v314_v1  ;;  %v21_v8 = vld [vmem:[%s443_s0] sm:$0xff] }
   0x5   :  { %247 = vmatprep.subr.mxu0 %v314_v1  ;;  %257 = vmatpush3.msra.mxu1 %v122_v4  ;;  %v120_v9 = vld [vmem:[%s446_s3 + $0x60] sm:$0xff] }
   0x6   :  { %248 = vmatpush3.msra.mxu0 %v23_v5  ;;  %258 = vmatprep.subr.mxu1 %v314_v1 }
   0x7   :  { %10 = vsyncpa [#allocation3], 0  ;;  %249 = vmatprep.subr.mxu0 %v314_v1  ;;  %259 = vmatpush3.msra.mxu1 %v121_v6  ;;  %v119_v10 = vld [vmem:[%s446_s3 + $0x58] sm:$0xff]  ;;  %v118_v11 = vld [vmem:[%s446_s3 + $0x50] sm:$0xff]  ;;  %s316_s11 = smov [#allocation2]   ;;  %vm202_vm2 = vcmask 130048  }
   0x8   :  { %250 = vmatpush3.msra.mxu0 %v22_v7  ;;  %260 = vmatprep.subr.mxu1 %v314_v1  ;;  %v117_v12 = vld [vmem:[%s446_s3 + $0x48] sm:$0xff]  ;;  %v116_v13 = vld [vmem:[%s446_s3 + $0x40] sm:$0xff]  ;;  %v115_v14 = vld [vmem:[%s446_s3 + $0x38] sm:$0xff]  ;;  %s210_s0 = sshll.u32 %s316_s11, 4  ;;  %s211_s0 = int_to_ptr.vmem [resolvable:$true] %s210_s0 }
   0x9   :  { %252 = vmatmul.mubr.msk.f32.vlgmr.msra.gmra.mxu0 %vm33_vm1, %v21_v8  ;;  %261 = vmatpush3.msra.mxu1 %v120_v9  ;;  %v114_v15 = vld [vmem:[%s446_s3 + $0x30] sm:$0xff]  ;;  %v113_v16 = vld [vmem:[%s446_s3 + $0x28] sm:$0xff]  ;;  %v112_v17 = vld [vmem:[%s446_s3 + $0x20] sm:$0xff]  ;;  %p297_p1 = scmp.lt.s32.totalorder %s211_s0, %s211_s0 }
   0xa   :  { %262 = vmatprep.subr.mxu1 %v314_v1  ;;  %286 = vmatprep.mubr.msk.f32.mxu1 %vm315_vm0, %v314_v1  ;;  %v111_v18 = vld [vmem:[%s446_s3 + $0x18] sm:$0xff]  ;;  %v110_v19 = vld [vmem:[%s446_s3 + $0x10] sm:$0xff]  ;;  %v109_v20 = vld [vmem:[%s446_s3 + $0x8] sm:$0xff] }
   0xb   :  { %263 = vmatpush3.msra.mxu1 %v119_v10  ;;  %v108_v21 = vld [vmem:[%s446_s3] sm:$0xff]  ;;  %s292_s3 = scalar_lea.vmem %s211_s0, 128 }
   0xc   :  { %264 = vmatprep.subr.mxu1 %v314_v1  ;;  %v218_v22 = vld [vmem:[%s445_s2] ss:$0 sm:$0xff]  ;;  %p293_p0 = scmp.ne.s32.totalorder %s211_s0, %s292_s3  ;;  %p298_p2 = scmp.lt.s32.totalorder %s292_s3, %s292_s3 }
   0xd   :  { %265 = vmatpush3.msra.mxu1 %v118_v11  ;;  %v220_v27 = vld [vmem:[%s447_s4] ss:$0 sm:$0xff] }
   0xe   :  { %266 = vmatprep.subr.mxu1 %v314_v1  ;;  %p299_p3 = por %p298_p2, %p297_p1 }
   0xf   :  { %267 = vmatpush3.msra.mxu1 %v117_v12 }
  0x10   :  { %268 = vmatprep.subr.mxu1 %v314_v1  ;;  %p300_p4 = pnand %p299_p3, %p293_p0 }
  0x11   :  { %269 = vmatpush3.msra.mxu1 %v116_v13 }
  0x12   :  { %270 = vmatprep.subr.mxu1 %v314_v1 }
  0x13   :  { %271 = vmatpush3.msra.mxu1 %v115_v14 }
  0x14   :  { %272 = vmatprep.subr.mxu1 %v314_v1 }
  0x15   :  { %273 = vmatpush3.msra.mxu1 %v114_v15 }
  0x16   :  { %274 = vmatprep.subr.mxu1 %v314_v1 }
  0x17   :  { %275 = vmatpush3.msra.mxu1 %v113_v16 }
  0x18   :  { %276 = vmatprep.subr.mxu1 %v314_v1 }
  0x19   :  { %277 = vmatpush3.msra.mxu1 %v112_v17 }
  0x1a   :  { %278 = vmatprep.subr.mxu1 %v314_v1 }
  0x1b   :  { %279 = vmatpush3.msra.mxu1 %v111_v18 }
  0x1c   :  { %280 = vmatprep.subr.mxu1 %v314_v1 }
  0x1d   :  { %281 = vmatpush3.msra.mxu1 %v110_v19 }
  0x1e   :  { %282 = vmatprep.subr.mxu1 %v314_v1 }
  0x1f   :  { %283 = vmatpush3.msra.mxu1 %v109_v20 }
  0x20   :  { %284 = vmatprep.subr.mxu1 %v314_v1 }
  0x21   :  { %285 = vmatpush3.msra.mxu1 %v108_v21 }
  0xc9   :  { %v103_v23 = vpop.f32.mrf.mxu0 }
  0xca   :  { %v104_v24 = vadd.f32 %v218_v22, %v103_v23 }
  0xcb   :  { %v253_v25 = vpop.f32.mrf.mxu0 }
  0xcc   :  { %v107_v26 = vmax.f32 %v104_v24, 0.0 }
  0xce   :  { %287 = vmatmul.mubr.f32.vlgmr.msra.gmra.mxu1 %v107_v26 }
 0x18e   :  { %v197_v28 = vpop.f32.mrf.mxu1 }
 0x18f   :  { %v198_v29 = vadd.f32 %v220_v27, %v197_v28 }
 0x190   :  { %v288_v30 = vpop.f32.mrf.mxu1 }
 0x191   :  { %v201_v31 = vmax.f32 %v198_v29, 0.0 }
 0x193   :  { %203 = vst.msk [vmem:[#allocation2] sm:$0xff] %vm202_vm2, %v201_v31 }
 0x194   :  { %303 = shalt.err (!%p300_p4)
}
 0x195   :  { %213 = dma.vmem_to_hbm [thread:$0]  %s211_s0, 128, %s448_s5, [#allocation3]  }
 0x196   :  { %312 = dma.done.wait [#allocation3], 128  }
 0x197   :  { %313 = vsyncadd [#allocation3], 4294967168 }
 0x198   :  { %217 = vsyncpa [#allocation3], 1 }

</bundles_post_ra>
